<compile_context>
chip_gen: v7x
topology: tpu7x:2x2x1
jax: 0.10.0
libtpu: 0.0.40
codegen_flags: <defaults>
</compile_context>

<pallas_src>
import functools

import jax
import jax.numpy as jnp
from jax import lax
from jax.experimental import pallas as pl
from jax.experimental.pallas import tpu as pltpu

_EPS = 1e-5


def _row_tile(m):
    # bigger row tiles keep the HBM pipeline fed (v5e especially)
    return min(m, 512)


def _chunk_len(L):
    for t in (16, 8, 4, 2, 1):
        if L % t == 0:
            return t
    return 1


def _par(n=1):
    return pltpu.CompilerParams(dimension_semantics=("parallel",) * n)


# ----------------------------------------------------------------------------
# RMSNorm (+ optional residual add) + in_proj  (single concatenated weight)
# ----------------------------------------------------------------------------

def _norm_in_proj_kernel(h_ref, w_ref, win_ref, x_ref, z_ref, *, d_inner):
    h = h_ref[...]
    ms = jnp.mean(h * h, axis=1, keepdims=True)
    normed = (h * lax.rsqrt(ms + _EPS) * w_ref[...]).astype(jnp.bfloat16)
    xz = jnp.dot(normed, win_ref[...], preferred_element_type=jnp.float32)
    x_ref[...] = xz[:, :d_inner]
    z_ref[...] = xz[:, d_inner:]


def norm_in_proj(hidden2d, norm_w, w_in, d_inner):
    M, D = hidden2d.shape
    N2 = w_in.shape[1]
    tm = _row_tile(M)
    kern = functools.partial(_norm_in_proj_kernel, d_inner=d_inner)
    return pl.pallas_call(
        kern,
        grid=(pl.cdiv(M, tm),),
        out_shape=(jax.ShapeDtypeStruct((M, d_inner), jnp.float32),
                   jax.ShapeDtypeStruct((M, d_inner), jnp.float32)),
        in_specs=[pl.BlockSpec((tm, D), lambda i: (i, 0)),
                  pl.BlockSpec((1, D), lambda i: (0, 0)),
                  pl.BlockSpec((D, N2), lambda i: (0, 0))],
        out_specs=(pl.BlockSpec((tm, d_inner), lambda i: (i, 0)),
                   pl.BlockSpec((tm, d_inner), lambda i: (i, 0))),
        compiler_params=_par(1),
    )(hidden2d, norm_w, w_in)


def _add_norm_in_proj_kernel(h_ref, r_ref, w_ref, win_ref,
                             res_ref, x_ref, z_ref, *, d_inner):
    res = h_ref[...] + r_ref[...]
    res_ref[...] = res                                 # residual stream (f32)
    ms = jnp.mean(res * res, axis=1, keepdims=True)
    normed = (res * lax.rsqrt(ms + _EPS) * w_ref[...]).astype(jnp.bfloat16)
    xz = jnp.dot(normed, win_ref[...], preferred_element_type=jnp.float32)
    x_ref[...] = xz[:, :d_inner]
    z_ref[...] = xz[:, d_inner:]


def add_norm_in_proj(hidden2d, resid2d, norm_w, w_in, d_inner):
    M, D = hidden2d.shape
    N2 = w_in.shape[1]
    tm = _row_tile(M)
    kern = functools.partial(_add_norm_in_proj_kernel, d_inner=d_inner)
    return pl.pallas_call(
        kern,
        grid=(pl.cdiv(M, tm),),
        out_shape=(jax.ShapeDtypeStruct((M, D), jnp.float32),
                   jax.ShapeDtypeStruct((M, d_inner), jnp.float32),
                   jax.ShapeDtypeStruct((M, d_inner), jnp.float32)),
        in_specs=[pl.BlockSpec((tm, D), lambda i: (i, 0)),
                  pl.BlockSpec((tm, D), lambda i: (i, 0)),
                  pl.BlockSpec((1, D), lambda i: (0, 0)),
                  pl.BlockSpec((D, N2), lambda i: (0, 0))],
        out_specs=(pl.BlockSpec((tm, D), lambda i: (i, 0)),
                   pl.BlockSpec((tm, d_inner), lambda i: (i, 0)),
                   pl.BlockSpec((tm, d_inner), lambda i: (i, 0))),
        compiler_params=_par(1),
    )(hidden2d, resid2d, norm_w, w_in)


# ----------------------------------------------------------------------------
# Fused residual-add + RMSNorm (final norm, no matmul)
# ----------------------------------------------------------------------------

def _add_norm_kernel(h_ref, r_ref, w_ref, o_ref):
    res = h_ref[...] + r_ref[...]
    ms = jnp.mean(res * res, axis=1, keepdims=True)
    o_ref[...] = res * lax.rsqrt(ms + _EPS) * w_ref[...]


def add_rmsnorm(hidden2d, resid2d, norm_w):
    M, D = hidden2d.shape
    tm = _row_tile(M)
    return pl.pallas_call(
        _add_norm_kernel,
        grid=(pl.cdiv(M, tm),),
        out_shape=jax.ShapeDtypeStruct((M, D), jnp.float32),
        in_specs=[pl.BlockSpec((tm, D), lambda i: (i, 0)),
                  pl.BlockSpec((tm, D), lambda i: (i, 0)),
                  pl.BlockSpec((1, D), lambda i: (0, 0))],
        out_specs=pl.BlockSpec((tm, D), lambda i: (i, 0)),
        compiler_params=_par(1),
    )(hidden2d, resid2d, norm_w)


# ----------------------------------------------------------------------------
# Fused depthwise causal conv1d + SiLU + (x_proj|dt_proj) matmul + softplus.
# reverse=True == conv of the flipped sequence, result in ORIGINAL order.
# Emits u (=SiLU(conv(x))), dt (post softplus) and [B|C] in one pass.
# ----------------------------------------------------------------------------

def _conv_proj_kernel(x_ref, cw_ref, cb_ref, wall_ref, bias_ref,
                      u_ref, dt_ref, bc_ref, xpad_ref, *, L, K, reverse):
    d = x_ref.shape[-1]
    # zero only the K-1 pad rows of the staging buffer
    if reverse:
        xpad_ref[pl.ds(0, L), :] = x_ref[...]
        xpad_ref[pl.ds(L, K - 1), :] = jnp.zeros((K - 1, d), jnp.float32)
    else:
        xpad_ref[pl.ds(0, K - 1), :] = jnp.zeros((K - 1, d), jnp.float32)
        xpad_ref[pl.ds(K - 1, L), :] = x_ref[...]
    acc = jnp.broadcast_to(cb_ref[...], (L, d))
    for k in range(K):                                  # K static -> unrolled
        start = (K - 1 - k) if reverse else k
        acc = acc + xpad_ref[pl.ds(start, L), :] * cw_ref[k:k + 1, :]
    u = acc * jax.nn.sigmoid(acc)                       # SiLU
    u_ref[...] = u
    # one fused lane-dense matmul: [W_dt_full | W_B | W_C], bf16 on the MXU
    proj = (jnp.dot(u.astype(jnp.bfloat16), wall_ref[...],
                    preferred_element_type=jnp.float32) + bias_ref[...])
    dt_ref[...] = jnp.logaddexp(proj[:, :d], 0.0)       # softplus on dt part
    bc_ref[...] = proj[:, d:]                           # [B | C]


def conv_silu_proj(x, conv_w, conv_b, w_all, bias_all, reverse):
    Bn, L, d = x.shape
    K = conv_w.shape[0]
    n2 = w_all.shape[1] - d
    kern = functools.partial(_conv_proj_kernel, L=L, K=K, reverse=reverse)
    return pl.pallas_call(
        kern,
        grid=(Bn,),
        out_shape=(jax.ShapeDtypeStruct((Bn, L, d), jnp.float32),
                   jax.ShapeDtypeStruct((Bn, L, d), jnp.float32),
                   jax.ShapeDtypeStruct((Bn, L, n2), jnp.float32)),
        in_specs=[pl.BlockSpec((None, L, d), lambda i: (i, 0, 0)),
                  pl.BlockSpec((K, d), lambda i: (0, 0)),
                  pl.BlockSpec((1, d), lambda i: (0, 0)),
                  pl.BlockSpec((d, d + n2), lambda i: (0, 0)),
                  pl.BlockSpec((1, d + n2), lambda i: (0, 0))],
        out_specs=(pl.BlockSpec((None, L, d), lambda i: (i, 0, 0)),
                   pl.BlockSpec((None, L, d), lambda i: (i, 0, 0)),
                   pl.BlockSpec((None, L, n2), lambda i: (i, 0, 0))),
        scratch_shapes=[pltpu.VMEM((L + K - 1, d), jnp.float32)],
        compiler_params=_par(1),
    )(x, conv_w, conv_b, w_all, bias_all)


# ----------------------------------------------------------------------------
# Chunked selective scan + skip (u*D) + SiLU(z) gate.
# Inputs are pre-chunked on the host: u/dt/z/out = (Bn, nc, T, d),
# B/C = (Bn, nc, 2n, T)  (state dim on sublanes -> dense, no lane padding).
# reverse=True runs the recurrence from t = L-1 down to 0.
# ----------------------------------------------------------------------------

def _scan_kernel(u_ref, dt_ref, bct_ref, z_ref, a_ref, d_ref, o_ref,
                 *, n, T, reverse):
    nc = u_ref.shape[0]
    d = u_ref.shape[-1]
    A = a_ref[...]                        # (n, d) = -exp(A_log), precomputed
    Dv = d_ref[...]                       # (1, d)

    def chunk_body(c, state):
        ci = (nc - 1 - c) if reverse else c
        dt_c = dt_ref[ci]                 # (T, d)
        u_c = u_ref[ci]                   # (T, d)
        z_c = z_ref[ci]                   # (T, d)
        bct_c = bct_ref[ci]               # (2n, T) column-major B/C chunk
        rows = [None] * T
        for s in range(T):                # static -> exp() schedulable off the
            t = (T - 1 - s) if reverse else s          # serial state chain
            dt_row = dt_c[t:t + 1, :]                  # (1, d)
            dtu_row = dt_row * u_c[t:t + 1, :]         # (1, d)
            b_col = bct_c[0:n, t:t + 1]                # (n, 1)
            c_col = bct_c[n:, t:t + 1]                 # (n, 1)
            dA = jnp.exp(dt_row * A)                   # (n, d)
            state = dA * state + dtu_row * b_col       # (n, d) serial update
            rows[t] = jnp.sum(state * c_col, axis=0, keepdims=True)
        y_c = jnp.concatenate(rows, axis=0)            # (T, d), original order
        zg = z_c * jax.nn.sigmoid(z_c)                 # SiLU(z) gate
        o_ref[ci] = (y_c + u_c * Dv) * zg              # aligned (T, d) store
        return state

    lax.fori_loop(0, nc, chunk_body, jnp.zeros((n, d), jnp.float32))


def selective_scan_gate(u4, dt4, bct4, z4, A_neg, Dvec, reverse):
    Bn, nc, T, d = u4.shape
    n2 = bct4.shape[2]
    n = n2 // 2
    kern = functools.partial(_scan_kernel, n=n, T=T, reverse=reverse)
    return pl.pallas_call(
        kern,
        grid=(Bn,),
        out_shape=jax.ShapeDtypeStruct((Bn, nc, T, d), jnp.float32),
        in_specs=[pl.BlockSpec((None, nc, T, d), lambda i: (i, 0, 0, 0)),
                  pl.BlockSpec((None, nc, T, d), lambda i: (i, 0, 0, 0)),
                  pl.BlockSpec((None, nc, n2, T), lambda i: (i, 0, 0, 0)),
                  pl.BlockSpec((None, nc, T, d), lambda i: (i, 0, 0, 0)),
                  pl.BlockSpec((n, d), lambda i: (0, 0)),
                  pl.BlockSpec((1, d), lambda i: (0, 0))],
        out_specs=pl.BlockSpec((None, nc, T, d), lambda i: (i, 0, 0, 0)),
        compiler_params=_par(1),
    )(u4, dt4, bct4, z4, A_neg, Dvec)


# ----------------------------------------------------------------------------
# Fused (out_f + out_b) * 0.5 + out_proj,  and head linear (+bias)
# ----------------------------------------------------------------------------

def _avg_proj_kernel(a_ref, b_ref, w_ref, o_ref):
    x = ((a_ref[...] + b_ref[...]) * 0.5).astype(jnp.bfloat16)
    o_ref[...] = jnp.dot(x, w_ref[...], preferred_element_type=jnp.float32)


def avg_out_proj(a2d, b2d, w):
    M, d_in = a2d.shape
    N = w.shape[1]
    tm = _row_tile(M)
    return pl.pallas_call(
        _avg_proj_kernel,
        grid=(pl.cdiv(M, tm),),
        out_shape=jax.ShapeDtypeStruct((M, N), jnp.float32),
        in_specs=[pl.BlockSpec((tm, d_in), lambda i: (i, 0)),
                  pl.BlockSpec((tm, d_in), lambda i: (i, 0)),
                  pl.BlockSpec((d_in, N), lambda i: (0, 0))],
        out_specs=pl.BlockSpec((tm, N), lambda i: (i, 0)),
        compiler_params=_par(1),
    )(a2d, b2d, w)


def _linear_bias_kernel(x_ref, w_ref, b_ref, o_ref):
    o_ref[...] = (jnp.dot(x_ref[...].astype(jnp.bfloat16), w_ref[...],
                          preferred_element_type=jnp.float32) + b_ref[...])


def linear_bias(x2d, w, b):
    M, K = x2d.shape
    N = w.shape[1]
    tm = _row_tile(M)
    return pl.pallas_call(
        _linear_bias_kernel,
        grid=(pl.cdiv(M, tm),),
        out_shape=jax.ShapeDtypeStruct((M, N), jnp.float32),
        in_specs=[pl.BlockSpec((tm, K), lambda i: (i, 0)),
                  pl.BlockSpec((K, N), lambda i: (0, 0)),
                  pl.BlockSpec((1, N), lambda i: (0, 0))],
        out_specs=pl.BlockSpec((tm, N), lambda i: (i, 0)),
        compiler_params=_par(1),
    )(x2d, w, b)


# ----------------------------------------------------------------------------
# Model glue (plain JAX orchestration of the Pallas kernels)
# ----------------------------------------------------------------------------

def mamba_branch(x, z, bp, cfg, reverse):
    """mamba_inner_fn_no_out_proj for one direction (flip handled in-kernel)."""
    Bn, L, d = x.shape
    n = cfg["d_state"]
    T = _chunk_len(L)
    nc = L // T

    u, dt, bc = conv_silu_proj(x, bp["conv_w"], bp["conv_b"],
                               bp["w_all"], bp["bias_all"], reverse)

    # free reshapes + one tiny host-side transpose (B/C to column-major chunks)
    u4 = u.reshape(Bn, nc, T, d)
    dt4 = dt.reshape(Bn, nc, T, d)
    z4 = z.reshape(Bn, nc, T, d)
    bct4 = bc.reshape(Bn, nc, T, 2 * n).transpose(0, 1, 3, 2)

    y4 = selective_scan_gate(u4, dt4, bct4, z4, bp["A_neg"], bp["D"], reverse)
    return y4.reshape(Bn, L, d)


def block_forward(hidden, residual, lp, cfg):
    """ModifiedBlock.forward (fused_add_norm=False, drop_path=Identity)."""
    Bn, L, D = hidden.shape
    d_inner = cfg["d_inner"]
    h2d = hidden.reshape(-1, D)

    if residual is None:
        # layer 0: residual = hidden_states (no add, no zero-residual read)
        x2d, z2d = norm_in_proj(h2d, lp["norm_w"], lp["w_in"], d_inner)
        res = hidden
    else:
        res2d, x2d, z2d = add_norm_in_proj(h2d, residual.reshape(-1, D),
                                           lp["norm_w"], lp["w_in"], d_inner)
        res = res2d.reshape(Bn, L, D)

    x3 = x2d.reshape(Bn, L, d_inner)
    z3 = z2d.reshape(Bn, L, d_inner)

    out_f = mamba_branch(x3, z3, lp["fwd"], cfg, reverse=False)
    out_b = mamba_branch(x3, z3, lp["bwd"], cfg, reverse=True)

    out2d = avg_out_proj(out_f.reshape(-1, d_inner), out_b.reshape(-1, d_inner),
                         lp["out_proj_w"])
    return out2d.reshape(Bn, L, D), res


def vision_mamba_forward(x, token_position, params, cfg):
    """ModifiedVisionMamba.forward (return_features=False, middle cls token)."""
    Bn, L, D = x.shape
    hidden, residual = x, None
    for lp in params["layers"]:
        hidden, residual = block_forward(hidden, residual, lp, cfg)
    normed = add_rmsnorm(hidden.reshape(-1, D), residual.reshape(-1, D),
                         params["norm_f_w"]).reshape(Bn, L, D)
    feat = normed[:, token_position, :]                # cls-token readout
    return linear_bias(feat, params["head_w"], params["head_b"])


# ----------------------------------------------------------------------------
# Deterministic parameter init (shapes follow Mamba / Vim __init__)
# ----------------------------------------------------------------------------

def init_params(key, cfg):
    d_model, d_inner = cfg["d_model"], cfg["d_inner"]
    n, r, K = cfg["d_state"], cfg["dt_rank"], cfg["d_conv"]
    depth, ncls = cfg["depth"], cfg["num_classes"]

    keys = jax.random.split(key, depth * 16 + 4)
    it = iter(range(len(keys)))

    def nrm(shape, scale=0.02):
        return (scale * jax.random.normal(keys[next(it)], shape)).astype(jnp.float32)

    def branch():
        xproj_w = nrm((d_inner, r + 2 * n))            # x_proj (no bias)
        dtproj_w = nrm((r, d_inner), 0.2)
        dtproj_b = nrm((1, d_inner), 0.02)
        # fold x_proj[:, :dt_rank] @ dt_proj into one lane-dense matmul, then
        # concatenate with the B / C columns -> single bf16 MXU weight
        w_dt_full = xproj_w[:, :r] @ dtproj_w          # (d_inner, d_inner)
        w_all = jnp.concatenate([w_dt_full, xproj_w[:, r:]],
                                axis=1).astype(jnp.bfloat16)
        bias_all = jnp.concatenate(
            [dtproj_b, jnp.zeros((1, 2 * n), jnp.float32)], axis=1)
        # A stored transposed (n, d_inner), with -exp() precomputed at init
        A_log_t = jnp.tile(
            jnp.log(jnp.arange(1, n + 1, dtype=jnp.float32))[:, None],
            (1, d_inner))
        return dict(
            conv_w=nrm((K, d_inner), 0.2),
            conv_b=nrm((1, d_inner), 0.02),
            w_all=w_all,
            bias_all=bias_all,
            A_neg=-jnp.exp(A_log_t),
            D=jnp.ones((1, d_inner), jnp.float32),
        )

    layers = []
    for _ in range(depth):
        layers.append(dict(
            norm_w=jnp.ones((1, d_model), jnp.float32),
            # in_proj x / z halves concatenated into one (D, 2*d_inner) weight
            w_in=jnp.concatenate([nrm((d_model, d_inner)),
                                  nrm((d_model, d_inner))],
                                 axis=1).astype(jnp.bfloat16),
            out_proj_w=nrm((d_inner, d_model)).astype(jnp.bfloat16),
            fwd=branch(),
            bwd=branch(),
        ))

    return dict(
        layers=layers,
        norm_f_w=jnp.ones((1, d_model), jnp.float32),
        head_w=nrm((d_model, ncls)).astype(jnp.bfloat16),
        head_b=jnp.zeros((1, ncls), jnp.float32),
    )


# ----------------------------------------------------------------------------
# Main
# ----------------------------------------------------------------------------

if __name__ == "__main__":
    cfg = dict(
        d_model=64,      # embedding dim
        d_state=16,      # SSM state size N
        d_conv=4,        # depthwise conv width
        expand=2,
        d_inner=128,     # expand * d_model  (full 128-lane width)
        dt_rank=4,       # ceil(d_model / 16)
        depth=2,         # number of ModifiedBlock layers
        num_classes=10,
    )
    B, L = 2, 8
    token_position = 4   # middle cls token position

    key = jax.random.PRNGKey(0)
    pkey, xkey = jax.random.split(key)
    params = init_params(pkey, cfg)

    # input: patch-embedded token sequence (B, L, d_model) — see TODO(synk).
    x = jax.random.normal(xkey, (B, L, cfg["d_model"]), dtype=jnp.float32)

    logits = vision_mamba_forward(x, token_position, params, cfg)
    logits = jax.block_until_ready(logits)

    assert logits.shape == (B, cfg["num_classes"])
    assert bool(jnp.all(jnp.isfinite(logits)))
    print("KERNEL_OK")
</pallas_src>

<mosaic_0001>
module attributes {stable_mosaic.version = 11 : i64} {
  func.func @_norm_in_proj_kernel(%arg0: i32, %arg1: memref<16x64xf32, #tpu.memory_space<vmem>>, %arg2: memref<1x64xf32, #tpu.memory_space<vmem>>, %arg3: memref<64x256xbf16, #tpu.memory_space<vmem>>, %arg4: memref<16x128xf32, #tpu.memory_space<vmem>>, %arg5: memref<16x128xf32, #tpu.memory_space<vmem>>) attributes {dimension_semantics = [#tpu.dimension_semantics<parallel>], iteration_bounds = array<i64: 1>, scalar_prefetch = 0 : i64, scratch_operands = 0 : i64, tpu.core_type = #tpu.core_type<tc>, window_params = [{transform_indices = @transform_0, window_bounds = array<i64: 16, 64>}, {pipeline_mode = #tpu.pipeline_mode<synchronous>, transform_indices = @transform_1, window_bounds = array<i64: 1, 64>}, {pipeline_mode = #tpu.pipeline_mode<synchronous>, transform_indices = @transform_2, window_bounds = array<i64: 64, 256>}, {transform_indices = @transform_3, window_bounds = array<i64: 16, 128>}, {transform_indices = @transform_4, window_bounds = array<i64: 16, 128>}]} {
    %c0 = arith.constant 0 : index
    %c0_0 = arith.constant 0 : index
    %0 = vector.load %arg1[%c0, %c0_0] : memref<16x64xf32, #tpu.memory_space<vmem>>, vector<16x64xf32>
    %1 = arith.mulf %0, %0 : vector<16x64xf32>
    %cst = arith.constant dense<0.000000e+00> : vector<16xf32>
    %2 = vector.multi_reduction <add>, %1, %cst [1] : vector<16x64xf32> to vector<16xf32>
    %3 = vector.shape_cast %2 : vector<16xf32> to vector<16x1xf32>
    %cst_1 = arith.constant 6.400000e+01 : f32
    %4 = vector.broadcast %cst_1 : f32 to vector<16x1xf32>
    %5 = arith.divf %3, %4 : vector<16x1xf32>
    %cst_2 = arith.constant 9.99999974E-6 : f32
    %6 = vector.broadcast %cst_2 : f32 to vector<16x1xf32>
    %7 = arith.addf %5, %6 : vector<16x1xf32>
    %8 = math.rsqrt %7 : vector<16x1xf32>
    %9 = vector.broadcast %8 : vector<16x1xf32> to vector<16x64xf32>
    %10 = arith.mulf %0, %9 : vector<16x64xf32>
    %c0_3 = arith.constant 0 : index
    %c0_4 = arith.constant 0 : index
    %11 = vector.load %arg2[%c0_3, %c0_4] : memref<1x64xf32, #tpu.memory_space<vmem>>, vector<1x64xf32>
    %12 = vector.broadcast %11 : vector<1x64xf32> to vector<16x64xf32>
    %13 = arith.mulf %10, %12 : vector<16x64xf32>
    %14 = arith.truncf %13 : vector<16x64xf32> to vector<16x64xbf16>
    %c0_5 = arith.constant 0 : index
    %c0_6 = arith.constant 0 : index
    %15 = vector.load %arg3[%c0_5, %c0_6] : memref<64x256xbf16, #tpu.memory_space<vmem>>, vector<64x256xbf16>
    %cst_7 = arith.constant dense<0.000000e+00> : vector<16x256xf32>
    %16 = tpu.matmul %14, %15, %cst_7 {dimension_numbers = #tpu.dot_dimension_numbers<[1], [0], [0], [1], [0, 0, 1, 1], [], []>} : vector<16x64xbf16>, vector<64x256xbf16>, vector<16x256xf32> -> vector<16x256xf32>
    %17 = vector.extract_strided_slice %16 {offsets = [0, 0], sizes = [16, 128], strides = [1, 1]} : vector<16x256xf32> to vector<16x128xf32>
    %c0_8 = arith.constant 0 : index
    %c0_9 = arith.constant 0 : index
    %18 = vector.load %arg4[%c0_8, %c0_9] : memref<16x128xf32, #tpu.memory_space<vmem>>, vector<16x128xf32>
    tpu.vector_store %arg4[%c0_8, %c0_9], %17 {strides = array<i32>} : memref<16x128xf32, #tpu.memory_space<vmem>>, vector<16x128xf32>,
    %19 = vector.extract_strided_slice %16 {offsets = [0, 128], sizes = [16, 128], strides = [1, 1]} : vector<16x256xf32> to vector<16x128xf32>
    %c0_10 = arith.constant 0 : index
    %c0_11 = arith.constant 0 : index
    %20 = vector.load %arg5[%c0_10, %c0_11] : memref<16x128xf32, #tpu.memory_space<vmem>>, vector<16x128xf32>
    tpu.vector_store %arg5[%c0_10, %c0_11], %19 {strides = array<i32>} : memref<16x128xf32, #tpu.memory_space<vmem>>, vector<16x128xf32>,
    return
  }
  func.func @transform_0(%arg0: i32) -> (i32, i32) {
    %c0_i32 = arith.constant 0 : i32
    %c0_i32_0 = arith.constant 0 : i32
    return %arg0, %c0_i32 : i32, i32
  }
  func.func @transform_1(%arg0: i32) -> (i32, i32) {
    %c0_i32 = arith.constant 0 : i32
    %c0_i32_0 = arith.constant 0 : i32
    %c0_i32_1 = arith.constant 0 : i32
    return %c0_i32, %c0_i32_0 : i32, i32
  }
  func.func @transform_2(%arg0: i32) -> (i32, i32) {
    %c0_i32 = arith.constant 0 : i32
    %c0_i32_0 = arith.constant 0 : i32
    %c0_i32_1 = arith.constant 0 : i32
    return %c0_i32, %c0_i32_0 : i32, i32
  }
  func.func @transform_3(%arg0: i32) -> (i32, i32) {
    %c0_i32 = arith.constant 0 : i32
    %c0_i32_0 = arith.constant 0 : i32
    return %arg0, %c0_i32 : i32, i32
  }
  func.func @transform_4(%arg0: i32) -> (i32, i32) {
    %c0_i32 = arith.constant 0 : i32
    %c0_i32_0 = arith.constant 0 : i32
    return %arg0, %c0_i32 : i32, i32
  }
}

</mosaic_0001>

<bundles_post_ra>
// kernel: tpu_custom_call.1
= control target key start
LH: loop header
LB: loop body
LE: loop exit
PB: predicated region body
PF: predicated region fallthrough
CT: control target
= control target key end

     0   :  { %10 = vsyncpa [#allocation3], 0  ;;  %s443_s0 = inlined_call_operand.hbm [shape: f32[16,64], index: 0, kind: input, shape index: {}]   ;;  %s444_s1 = inlined_call_operand.vmem [shape: f32[1,64], index: 1, kind: input, shape index: {}]   ;;  %s445_s2 = inlined_call_operand.hbm [shape: bf16[64,256], index: 2, kind: input, shape index: {}]   ;;  %s446_s3 = inlined_call_operand.hbm [shape: f32[16,128], index: 3, kind: output, shape index: {0}]   ;;  %s447_s4 = inlined_call_operand.hbm [shape: f32[16,128], index: 4, kind: output, shape index: {1}]  }
   0x1   :  { %11 = vsyncpa [#allocation6], 0 }
   0x2   :  { %12 = vsyncpa [#allocation4], 0 }
   0x3   :  { %13 = vsyncpa [#allocation9], 0  ;;  %s338_s15 = smov [#allocation2]   ;;  %s242_s19 = scalar_lea.hbm %s443_s0, 256 }
   0x4   :  { %s19_s16 = sshll.u32 %s338_s15, 4  ;;  %p243_p0 = scmp.ne.s32.totalorder %s443_s0, %s242_s19  ;;  %s20_s16 = int_to_ptr.vmem [resolvable:$true] %s19_s16 }
   0x5   :  { %p246_p1 = scmp.lt.u32.totalorder %s242_s19, %s443_s0 }
   0x7   :  { %p248_p2 = pnand %p246_p1, %p243_p0 }
   0x9   :  { %251 = shalt.err (!%p248_p2)
}
   0xa   :  { %s252_s24 = scalar_lea.vmem %s20_s16, 256  ;;  %p257_p4 = scmp.lt.s32.totalorder %s20_s16, %s20_s16 }
   0xb   :  { %p253_p3 = scmp.ne.s32.totalorder %s20_s16, %s252_s24  ;;  %p258_p5 = scmp.lt.s32.totalorder %s252_s24, %s252_s24 }
   0xd   :  { %p259_p6 = por %p258_p5, %p257_p4 }
   0xf   :  { %p260_p7 = pnand %p259_p6, %p253_p3 }
  0x11   :  { %263 = shalt.err (!%p260_p7)
}
  0x12   :  { %s339_s25 = smov 128   ;;  %s340_s26 = smov 8  }
  0x13   :  { %25 = dma.hbm_to_vmem [thread:$0]  %s443_s0, 256, %s20_s16, [#allocation3], %s339_s25, %s339_s25, %s340_s26  }
  0x14   :  { %s341_s29 = smov [#allocation5]   ;;  %s264_s7 = scalar_lea.hbm %s445_s2, 1024 }
  0x15   :  { %s33_s30 = sshll.u32 %s341_s29, 4  ;;  %p265_p8 = scmp.ne.s32.totalorder %s445_s2, %s264_s7  ;;  %s34_s30 = int_to_ptr.vmem [resolvable:$true] %s33_s30 }
  0x16   :  { %p268_p9 = scmp.lt.u32.totalorder %s264_s7, %s445_s2 }
  0x18   :  { %p270_p10 = pnand %p268_p9, %p265_p8 }
  0x1a   :  { %273 = shalt.err (!%p270_p10)
}
  0x1b   :  { %s274_s12 = scalar_lea.vmem %s34_s30, 1024  ;;  %p279_p12 = scmp.lt.s32.totalorder %s34_s30, %s34_s30 }
  0x1c   :  { %p275_p11 = scmp.ne.s32.totalorder %s34_s30, %s274_s12  ;;  %p280_p13 = scmp.lt.s32.totalorder %s274_s12, %s274_s12 }
  0x1e   :  { %p281_p0 = por %p280_p13, %p279_p12 }
  0x20   :  { %p282_p1 = pnand %p281_p0, %p275_p11 }
  0x22   :  { %285 = shalt.err (!%p282_p1)
}
  0x23   :  { %39 = dma.hbm_to_vmem [thread:$0]  %s445_s2, 1024, %s34_s30, [#allocation6], %s339_s25, %s339_s25, %s340_s26  }
  0x24   :  { %330 = dma.done.wait [#allocation3], 256  }
  0x25   :  { %331 = vsyncadd [#allocation3], 4294967040 }
  0x26   :  { %332 = dma.done.wait [#allocation6], 1024  }
  0x27   :  { %333 = vsyncadd [#allocation6], 4294966272  ;;  %v47_v0 = vld [vmem:[#allocation2] sm:$0xff]  ;;  %vm51_vm0 = vcmask 523264   ;;  %v48_v1 = vld [vmem:[#allocation2 + $0x8] sm:$0xff]  ;;  %v342_v11 = vmov 0  }
  0x28   :  { %v49_v2 = vmul.f32 %v47_v0, %v47_v0  ;;  %v50_v3 = vmul.f32 %v48_v1, %v48_v1  ;;  %v226_v6 = vld [vmem:[#allocation5 + $0x4] ss:$8 sps:$4 sm:$0xff]   ;;  %v228_v7 = vld [vmem:[#allocation5] ss:$8 sps:$4 sm:$0xff]   ;;  %v229_v8 = vld [vmem:[#allocation5 + $0x14] ss:$8 sps:$4 sm:$0xff]   ;;  %160 = vmatprep.mubr.bf16.mxu0 %v342_v11 }
  0x29   :  { %128 = vmatprep.subr.bf16.mxu0 %v226_v6  ;;  %v231_v9 = vld [vmem:[#allocation5 + $0x10] ss:$8 sps:$4 sm:$0xff]   ;;  %v232_v10 = vld [vmem:[#allocation5 + $0x24] ss:$8 sps:$4 sm:$0xff]   ;;  %v234_v12 = vld [vmem:[#allocation5 + $0x20] ss:$8 sps:$4 sm:$0xff]  }
  0x2a   :  { %v52_v4 = vsel %vm51_vm0, %v49_v2, 0.0  ;;  %v55_v5 = vsel %vm51_vm0, %v50_v3, 0.0  ;;  %129 = vmatpush1.bf16.msra.mxu0 %v228_v7  ;;  %v235_v13 = vld [vmem:[#allocation5 + $0x34] ss:$8 sps:$4 sm:$0xff]   ;;  %v237_v14 = vld [vmem:[#allocation5 + $0x30] ss:$8 sps:$4 sm:$0xff]  }
  0x2b   :  { %53 = vadd.xlane.f32.xlu0 %v52_v4  ;;  %130 = vmatprep.subr.bf16.mxu0 %v229_v8  ;;  %v209_v24 = vld [vmem:[%s444_s1] ss:$0 sm:$0xff]  ;;  %s343_s15 = smov [#allocation7]   ;;  %s344_s17 = smov [#allocation8]  }
  0x2c   :  { %s180_s16 = sshll.u32 %s343_s15, 4  ;;  %s192_s18 = sshll.u32 %s344_s17, 4  ;;  %s181_s16 = int_to_ptr.vmem [resolvable:$true] %s180_s16  ;;  %s406_s18 = int_to_ptr.vmem [resolvable:$true] %s192_s18 }
  0x2d   :  { %s286_s1 = scalar_lea.vmem %s181_s16, 256  ;;  %p291_p3 = scmp.lt.s32.totalorder %s181_s16, %s181_s16 }
  0x2e   :  { %131 = vmatpush1.bf16.msra.mxu0 %v231_v9  ;;  %p287_p2 = scmp.ne.s32.totalorder %s181_s16, %s286_s1  ;;  %p292_p4 = scmp.lt.s32.totalorder %s286_s1, %s286_s1 }
  0x2f   :  { %56 = vadd.xlane.f32.xlu0 %v55_v5  ;;  %132 = vmatprep.subr.bf16.mxu0 %v232_v10 }
  0x30   :  { %p293_p5 = por %p292_p4, %p291_p3 }
  0x32   :  { %133 = vmatpush1.bf16.msra.mxu0 %v234_v12  ;;  %p294_p6 = pnand %p293_p5, %p287_p2 }
  0x33   :  { %134 = vmatprep.subr.bf16.mxu0 %v235_v13 }
  0x36   :  { %135 = vmatpush1.bf16.msra.mxu0 %v237_v14 }
  0xb8   :  { %v54_v15 = vpop.xlane.xlu0 %53 }
  0xb9   :  { %v59_v16 = vmul.f32 0.015625, %v54_v15 }
  0xbb   :  { %v61_v17 = vadd.f32 1e-05, %v59_v16 }
  0xbc   :  { %v57_v18 = vpop.xlane.xlu0 %56 }
  0xbd   :  { %238 = vrsqrt.f32 %v61_v17  ;;  %v60_v19 = vmul.f32 0.015625, %v57_v18 }
  0xbf   :  { %v62_v20 = vadd.f32 1e-05, %v60_v19 }
  0xc1   :  { %240 = vrsqrt.f32 %v62_v20 }
  0xc7   :  { %v239_v21 = vpop.eup %238 }
  0xc8   :  { %v65_v22 = vmul.f32 %v239_v21, %v47_v0 }
  0xca   :  { %v74_v26 = vmul.f32 %v209_v24, %v65_v22 }
  0xcb   :  { %v241_v23 = vpop.eup %240 }
  0xcc   :  { %v66_v25 = vmul.f32 %v241_v23, %v48_v1 }
  0xce   :  { %v75_v27 = vmul.f32 %v209_v24, %v66_v25 }
  0xd0   :  { %v76_v28 = vpack.c.bf16 %v75_v27, %v74_v26 }
  0xd2   :  { %218 = vmatmul.mubr.msk.bf16.vlgmr.msra.gmra.mrb[0].mxu0 %vm51_vm0, %v76_v28 }
 0x1a5   :  { %v162_v29 = vpop.f32.mrb[0].mxu0 }
 0x1a6   :  { %171 = vst [vmem:[#allocation7] sm:$0xff] %v162_v29  ;;  %v164_v30 = vpop.f32.mrb[1].mxu0 }
 0x1a7   :  { %173 = vst [vmem:[#allocation8] sm:$0xff] %v164_v30  ;;  %v166_v31 = vpop.f32.mrb[2].mxu0 }
 0x1a8   :  { %172 = vst [vmem:[#allocation7 + $0x8] sm:$0xff] %v166_v31  ;;  %v168_v32 = vpop.f32.mrb[3].mxu0 }
 0x1a9   :  { %174 = vst [vmem:[#allocation8 + $0x8] sm:$0xff] %v168_v32 }
 0x1aa   :  { %297 = shalt.err (!%p294_p6)
}
 0x1ab   :  { %s298_s21 = scalar_lea.hbm %s446_s3, 256 }
 0x1ac   :  { %p299_p7 = scmp.ne.s32.totalorder %s446_s3, %s298_s21  ;;  %p302_p8 = scmp.lt.u32.totalorder %s298_s21, %s446_s3 }
 0x1ae   :  { %p304_p9 = pnand %p302_p8, %p299_p7 }
 0x1b0   :  { %307 = shalt.err (!%p304_p9)
}
 0x1b1   :  { %186 = dma.vmem_to_hbm [thread:$0]  %s181_s16, 256, %s446_s3, [#allocation4], %s339_s25, %s339_s25, %s340_s26  }
 0x1b2   :  { %s308_s30 = scalar_lea.vmem %s406_s18, 256  ;;  %p313_p11 = scmp.lt.s32.totalorder %s406_s18, %s406_s18 }
 0x1b3   :  { %p309_p10 = scmp.ne.s32.totalorder %s406_s18, %s308_s30  ;;  %p314_p12 = scmp.lt.s32.totalorder %s308_s30, %s308_s30 }
 0x1b5   :  { %p315_p13 = por %p314_p12, %p313_p11 }
 0x1b7   :  { %p316_p0 = pnand %p315_p13, %p309_p10 }
 0x1b9   :  { %319 = shalt.err (!%p316_p0)
}
 0x1ba   :  { %s320_s7 = scalar_lea.hbm %s447_s4, 256 }
 0x1bb   :  { %p321_p1 = scmp.ne.s32.totalorder %s447_s4, %s320_s7  ;;  %p324_p2 = scmp.lt.u32.totalorder %s320_s7, %s447_s4 }
 0x1bd   :  { %p326_p3 = pnand %p324_p2, %p321_p1 }
 0x1bf   :  { %329 = shalt.err (!%p326_p3)
}
 0x1c0   :  { %198 = dma.vmem_to_hbm [thread:$0]  %s406_s18, 256, %s447_s4, [#allocation9], %s339_s25, %s339_s25, %s340_s26  }
 0x1c1   :  { %334 = dma.done.wait [#allocation4], 256  }
 0x1c2   :  { %335 = vsyncadd [#allocation4], 4294967040 }
 0x1c3   :  { %336 = dma.done.wait [#allocation9], 256  }
 0x1c4   :  { %337 = vsyncadd [#allocation9], 4294967040 }
 0x1c5   :  { %205 = vsyncpa [#allocation3], 1 }
 0x1c6   :  { %206 = vsyncpa [#allocation6], 1 }
 0x1c7   :  { %207 = vsyncpa [#allocation4], 1 }
 0x1c8   :  { %208 = vsyncpa [#allocation9], 1 }

</bundles_post_ra>
